<compile_context>
chip_gen: v5e
topology: v5e:2x2
jax: 0.10.0
libtpu: 0.0.40
codegen_flags: <defaults>
</compile_context>

<pallas_src>
from functools import partial

import numpy as np
import jax
import jax.numpy as jnp
from jax import lax
from jax.experimental import pallas as pl
from jax.experimental.pallas import tpu as pltpu

_EPS = 1e-12
_LANES = 128


def _sinusoidal_embeddings(n_pos: int, dim: int) -> np.ndarray:
    """Match create_sinusoidal_embeddings exactly (float32)."""
    position_enc = np.array(
        [[pos / np.power(10000, 2 * (j // 2) / dim) for j in range(dim)]
         for pos in range(n_pos)]
    )
    out = np.zeros((n_pos, dim), dtype=np.float32)
    out[:, 0::2] = np.sin(position_enc[:, 0::2]).astype(np.float32)
    out[:, 1::2] = np.cos(position_enc[:, 1::2]).astype(np.float32)
    return out


def _round_up(n: int, m: int) -> int:
    return ((n + m - 1) // m) * m


def _vmem_budget():
    """(block target bytes, vmem_limit_bytes), split by TPU generation."""
    vmem_cap = 64 << 20                      # conservative default (v7x: 64 MiB/TC)
    try:
        info = pltpu.get_tpu_info()
        vmem_cap = int(getattr(info, "vmem_capacity_bytes", vmem_cap) or vmem_cap)
    except Exception:
        pass
    if vmem_cap >= (96 << 20):               # v5e / v6e: 128 MiB VMEM
        return 8 << 20, 96 << 20
    return 4 << 20, 48 << 20                 # v7x: 64 MiB VMEM -> keep headroom


def _choose_rows_tile(total_rows: int, row_bytes: int, target_bytes: int):
    """Pick (tile_rows, padded_total_rows).

    tile_rows is a multiple of 8 with tile_rows*row_bytes ~<= target_bytes, and
    padded_total_rows is a multiple of tile_rows (pad rows are sliced off later),
    so the BlockSpec pipeline always double-buffers with reasonably sized tiles.
    """
    cap = max(8, (target_bytes // max(row_bytes, 1)) // 8 * 8)
    if total_rows <= cap:
        padded = _round_up(total_rows, 8)
        return padded, padded
    # Prefer an exact multiple-of-8 divisor of total_rows (no row padding),
    # but not so small that pipelining efficiency collapses.
    floor = max(8, (cap // 4) // 8 * 8)
    t = cap
    while t >= floor:
        if total_rows % t == 0:
            return t, total_rows
        t -= 8
    # Fall back: pad up to a multiple of the target tile size.
    return cap, _round_up(total_rows, cap)


def _segment_sum(x, seg_width: int, masks):
    """Every lane gets the sum of its aligned `seg_width`-lane segment.

    seg_width is a power of two (it divides 128).  Rotate-and-add butterfly:
    XLU rolls + VPU selects -> exact f32, no MXU.  `masks` are the precomputed
    per-stage select masks (shared between the mean and variance passes).
    """
    w = x.shape[-1]
    out = x
    k = 1
    for m in masks:
        straight = pltpu.roll(out, k, axis=out.ndim - 1)
        wrapped = pltpu.roll(out, (k - seg_width) % w, axis=out.ndim - 1)
        out = out + jnp.where(m, straight, wrapped)
        k *= 2
    return out


def _embeddings_kernel(x_ref, pos_ref, scale_ref, o_ref, *, d, num_seg, lane_pad):
    """(x + pos) -> LayerNorm on a lane-dense (TS, W) tile.

    d        : true LayerNorm width (d_model)
    num_seg  : how many original rows are packed side-by-side per tile row
    lane_pad : number of zero-padded lanes at the end of each row (num_seg == 1 only)
    """
    x = x_ref[...].astype(jnp.float32) + pos_ref[...].astype(jnp.float32)

    if num_seg > 1:
        # Packed path: W = num_seg * d lanes, per-segment statistics.
        lane = lax.broadcasted_iota(jnp.int32, x.shape, x.ndim - 1)
        seg_pos = lane % d
        masks = []
        k = 1
        while k < d:                       # per-stage masks computed once, reused
            masks.append(seg_pos >= k)
            k *= 2
        inv_d = 1.0 / d
        mean = _segment_sum(x, d, masks) * inv_d
        xc = x - mean
        var = _segment_sum(xc * xc, d, masks) * inv_d
    elif lane_pad == 0:
        mean = jnp.mean(x, axis=-1, keepdims=True)
        xc = x - mean
        var = jnp.mean(xc * xc, axis=-1, keepdims=True)
    else:
        # Lane-padded path: padded lanes hold zeros; keep them out of the stats.
        lane = lax.broadcasted_iota(jnp.int32, x.shape, x.ndim - 1)
        valid = lane < d
        inv_d = 1.0 / d
        mean = jnp.sum(x, axis=-1, keepdims=True) * inv_d
        xc = jnp.where(valid, x - mean, 0.0)
        var = jnp.sum(xc * xc, axis=-1, keepdims=True) * inv_d

    y = xc * lax.rsqrt(var + _EPS)
    gamma = scale_ref[0:1, :]              # (1, W) f32, broadcasts over rows
    beta = scale_ref[1:2, :]
    o_ref[...] = (y * gamma + beta).astype(o_ref.dtype)


def embeddings_forward(x, pos_table, gamma, beta):
    """x: (B, S, D); pos_table: (max_pos, D); gamma/beta: (D,). Returns (B, S, D)."""
    B, S, D = x.shape
    pos = pos_table[:S]                    # position_ids = arange(S)

    target_bytes, vmem_limit = _vmem_budget()

    # ---- lane packing / padding decision -------------------------------------
    if D % _LANES == 0:
        group, W, d_pad = 1, D, 0
    elif _LANES % D == 0:
        group, W, d_pad = _LANES // D, _LANES, 0    # pack `group` rows per 128 lanes
    else:
        group = 1
        W = _round_up(D, _LANES)                    # pad lanes, mask stats in-kernel
        d_pad = W - D

    if d_pad:
        x = jnp.pad(x, ((0, 0), (0, 0), (0, d_pad)))
        pos = jnp.pad(pos, ((0, 0), (0, d_pad)))
        gamma = jnp.pad(gamma, (0, d_pad), constant_values=1.0)
        beta = jnp.pad(beta, (0, d_pad))

    # seq length must be a multiple of the packing group
    s_g = _round_up(S, group)
    if s_g != S:
        x = jnp.pad(x, ((0, 0), (0, s_g - S), (0, 0)))
        pos = jnp.pad(pos, ((0, s_g - S), (0, 0)))
    s_rows = s_g // group

    x_p = x.reshape(B, s_rows, W)          # free row-major reshape
    pos_p = pos.reshape(s_rows, W)

    # ---- row tiling (always pipelined; pad rows instead of one giant block) ---
    row_bytes = W * x.dtype.itemsize
    ts, rows_p = _choose_rows_tile(s_rows, row_bytes, target_bytes)
    if rows_p != s_rows:
        x_p = jnp.pad(x_p, ((0, 0), (0, rows_p - s_rows), (0, 0)))
        pos_p = jnp.pad(pos_p, ((0, rows_p - s_rows), (0, 0)))

    # gamma/beta as one resident (2, W) f32 input
    scale = jnp.stack(
        [jnp.tile(gamma.astype(jnp.float32), group),
         jnp.tile(beta.astype(jnp.float32), group)], axis=0)

    s_tiles = rows_p // ts
    grid = (s_tiles, B)                    # B innermost -> pos DMA skipped across b
    if s_tiles == 1 and B > 1:
        dim_sem = ("arbitrary", "parallel")
    else:
        dim_sem = ("parallel", "arbitrary")    # split seq tiles across TCs on v7x

    kernel = partial(_embeddings_kernel, d=D, num_seg=group, lane_pad=d_pad)

    out = pl.pallas_call(
        kernel,
        out_shape=jax.ShapeDtypeStruct((B, rows_p, W), x.dtype),
        grid_spec=pl.GridSpec(
            grid=grid,
            in_specs=[
                pl.BlockSpec((None, ts, W), lambda s, b: (b, s, 0)),   # x    -> (TS, W)
                pl.BlockSpec((ts, W), lambda s, b: (s, 0)),            # pos  (resident per s-tile)
                pl.BlockSpec((2, W), lambda s, b: (0, 0)),             # gamma/beta (fetched once)
            ],
            out_specs=pl.BlockSpec((None, ts, W), lambda s, b: (b, s, 0)),
        ),
        compiler_params=pltpu.CompilerParams(
            dimension_semantics=dim_sem,
            vmem_limit_bytes=vmem_limit,
        ),
    )(x_p, pos_p, scale)

    out = out[:, :s_rows, :].reshape(B, s_g, W // group)
    return out[:, :S, :D]


def reference_forward(x, pos_table, gamma, beta, eps=_EPS):
    S = x.shape[1]
    h = x + pos_table[:S][None, :, :]
    mean = jnp.mean(h, axis=-1, keepdims=True)
    var = jnp.mean(jnp.square(h - mean), axis=-1, keepdims=True)
    return (h - mean) / jnp.sqrt(var + eps) * gamma + beta


if __name__ == "__main__":
    # Module config (small, deterministic)
    d_model = 32
    language_len = 4
    vision_len = 4
    max_position_embeddings = language_len + vision_len   # = 8

    B, S, D = 2, max_position_embeddings, d_model

    pos_table = jnp.asarray(_sinusoidal_embeddings(max_position_embeddings, d_model))

    key = jax.random.PRNGKey(0)
    kx, kg, kb = jax.random.split(key, 3)
    x = jax.random.normal(kx, (B, S, D), dtype=jnp.float32)
    # LayerNorm affine params are learned; use non-trivial values so the packed
    # gamma/beta path is actually validated (defaults would be ones/zeros).
    gamma = 1.0 + 0.1 * jax.random.normal(kg, (D,), dtype=jnp.float32)
    beta = 0.1 * jax.random.normal(kb, (D,), dtype=jnp.float32)

    out = jax.block_until_ready(embeddings_forward(x, pos_table, gamma, beta))
    ref = reference_forward(x, pos_table, gamma, beta)
    np.testing.assert_allclose(np.asarray(out), np.asarray(ref), rtol=1e-5, atol=1e-5)

    print("KERNEL_OK")
</pallas_src>

<mosaic_0001>
module attributes {stable_mosaic.version = 11 : i64} {
  func.func @_embeddings_kernel(%arg0: i32, %arg1: i32, %arg2: memref<1x8x128xf32, #tpu.memory_space<vmem>>, %arg3: memref<8x128xf32, #tpu.memory_space<vmem>>, %arg4: memref<2x128xf32, #tpu.memory_space<vmem>>, %arg5: memref<1x8x128xf32, #tpu.memory_space<vmem>>) attributes {dimension_semantics = [#tpu.dimension_semantics<arbitrary>, #tpu.dimension_semantics<parallel>], iteration_bounds = array<i64: 1, 2>, scalar_prefetch = 0 : i64, scratch_operands = 0 : i64, tpu.core_type = #tpu.core_type<tc>, window_params = [{transform_indices = @transform_0, window_bounds = array<i64: 1, 8, 128>}, {transform_indices = @transform_1, window_bounds = array<i64: 8, 128>}, {pipeline_mode = #tpu.pipeline_mode<synchronous>, transform_indices = @transform_2, window_bounds = array<i64: 2, 128>}, {transform_indices = @transform_3, window_bounds = array<i64: 1, 8, 128>}]} {
    %c0 = arith.constant 0 : index
    %c0_0 = arith.constant 0 : index
    %c0_1 = arith.constant 0 : index
    %0 = vector.load %arg2[%c0, %c0_0, %c0_1] : memref<1x8x128xf32, #tpu.memory_space<vmem>>, vector<1x8x128xf32>
    %1 = vector.shape_cast %0 : vector<1x8x128xf32> to vector<8x128xf32>
    %c0_2 = arith.constant 0 : index
    %c0_3 = arith.constant 0 : index
    %2 = vector.load %arg3[%c0_2, %c0_3] : memref<8x128xf32, #tpu.memory_space<vmem>>, vector<8x128xf32>
    %3 = arith.addf %1, %2 : vector<8x128xf32>
    %4 = tpu.iota {dimensions = array<i32: 1>} : vector<8x128xi32>
    %c32_i32 = arith.constant 32 : i32
    %c0_i32 = arith.constant 0 : i32
    %5 = arith.cmpi eq, %c32_i32, %c0_i32 : i32
    %c1_i32 = arith.constant 1 : i32
    %6 = arith.select %5, %c1_i32, %c32_i32 : i32
    %7 = vector.broadcast %6 : i32 to vector<8x128xi32>
    %8 = arith.remsi %4, %7 : vector<8x128xi32>
    %c0_i32_4 = arith.constant 0 : i32
    %9 = vector.broadcast %c0_i32_4 : i32 to vector<8x128xi32>
    %10 = arith.cmpi ne, %8, %9 : vector<8x128xi32>
    %c0_i32_5 = arith.constant 0 : i32
    %11 = vector.broadcast %c0_i32_5 : i32 to vector<8x128xi32>
    %12 = arith.cmpi slt, %8, %11 : vector<8x128xi32>
    %c0_i32_6 = arith.constant 0 : i32
    %13 = arith.cmpi slt, %6, %c0_i32_6 : i32
    %14 = vector.broadcast %13 : i1 to vector<8x128xi1>
    %15 = vector.broadcast %14 : vector<8x128xi1> to vector<8x128xi1>
    %16 = arith.xori %12, %15 : vector<8x128xi1>
    %17 = arith.andi %16, %10 : vector<8x128xi1>
    %18 = vector.broadcast %6 : i32 to vector<8x128xi32>
    %19 = arith.addi %8, %18 : vector<8x128xi32>
    %20 = arith.select %17, %19, %8 : vector<8x128xi1>, vector<8x128xi32>
    %c1_i32_7 = arith.constant 1 : i32
    %21 = vector.broadcast %c1_i32_7 : i32 to vector<8x128xi32>
    %22 = arith.cmpi sge, %20, %21 : vector<8x128xi32>
    %c2_i32 = arith.constant 2 : i32
    %23 = vector.broadcast %c2_i32 : i32 to vector<8x128xi32>
    %24 = arith.cmpi sge, %20, %23 : vector<8x128xi32>
    %c4_i32 = arith.constant 4 : i32
    %25 = vector.broadcast %c4_i32 : i32 to vector<8x128xi32>
    %26 = arith.cmpi sge, %20, %25 : vector<8x128xi32>
    %c8_i32 = arith.constant 8 : i32
    %27 = vector.broadcast %c8_i32 : i32 to vector<8x128xi32>
    %28 = arith.cmpi sge, %20, %27 : vector<8x128xi32>
    %c16_i32 = arith.constant 16 : i32
    %29 = vector.broadcast %c16_i32 : i32 to vector<8x128xi32>
    %30 = arith.cmpi sge, %20, %29 : vector<8x128xi32>
    %c1_i32_8 = arith.constant 1 : i32
    %31 = tpu.dynamic_rotate %3 by %c1_i32_8 dim 1 : vector<8x128xf32>, i32 -> vector<8x128xf32>
    %c97_i32 = arith.constant 97 : i32
    %32 = tpu.dynamic_rotate %3 by %c97_i32 dim 1 : vector<8x128xf32>, i32 -> vector<8x128xf32>
    %33 = arith.select %22, %31, %32 : vector<8x128xi1>, vector<8x128xf32>
    %34 = arith.addf %3, %33 : vector<8x128xf32>
    %c2_i32_9 = arith.constant 2 : i32
    %35 = tpu.dynamic_rotate %34 by %c2_i32_9 dim 1 : vector<8x128xf32>, i32 -> vector<8x128xf32>
    %c98_i32 = arith.constant 98 : i32
    %36 = tpu.dynamic_rotate %34 by %c98_i32 dim 1 : vector<8x128xf32>, i32 -> vector<8x128xf32>
    %37 = arith.select %24, %35, %36 : vector<8x128xi1>, vector<8x128xf32>
    %38 = arith.addf %34, %37 : vector<8x128xf32>
    %c4_i32_10 = arith.constant 4 : i32
    %39 = tpu.dynamic_rotate %38 by %c4_i32_10 dim 1 : vector<8x128xf32>, i32 -> vector<8x128xf32>
    %c100_i32 = arith.constant 100 : i32
    %40 = tpu.dynamic_rotate %38 by %c100_i32 dim 1 : vector<8x128xf32>, i32 -> vector<8x128xf32>
    %41 = arith.select %26, %39, %40 : vector<8x128xi1>, vector<8x128xf32>
    %42 = arith.addf %38, %41 : vector<8x128xf32>
    %c8_i32_11 = arith.constant 8 : i32
    %43 = tpu.dynamic_rotate %42 by %c8_i32_11 dim 1 : vector<8x128xf32>, i32 -> vector<8x128xf32>
    %c104_i32 = arith.constant 104 : i32
    %44 = tpu.dynamic_rotate %42 by %c104_i32 dim 1 : vector<8x128xf32>, i32 -> vector<8x128xf32>
    %45 = arith.select %28, %43, %44 : vector<8x128xi1>, vector<8x128xf32>
    %46 = arith.addf %42, %45 : vector<8x128xf32>
    %c16_i32_12 = arith.constant 16 : i32
    %47 = tpu.dynamic_rotate %46 by %c16_i32_12 dim 1 : vector<8x128xf32>, i32 -> vector<8x128xf32>
    %c112_i32 = arith.constant 112 : i32
    %48 = tpu.dynamic_rotate %46 by %c112_i32 dim 1 : vector<8x128xf32>, i32 -> vector<8x128xf32>
    %49 = arith.select %30, %47, %48 : vector<8x128xi1>, vector<8x128xf32>
    %50 = arith.addf %46, %49 : vector<8x128xf32>
    %cst = arith.constant 3.125000e-02 : f32
    %51 = vector.broadcast %cst : f32 to vector<8x128xf32>
    %52 = arith.mulf %50, %51 : vector<8x128xf32>
    %53 = arith.subf %3, %52 : vector<8x128xf32>
    %54 = arith.mulf %53, %53 : vector<8x128xf32>
    %c1_i32_13 = arith.constant 1 : i32
    %55 = tpu.dynamic_rotate %54 by %c1_i32_13 dim 1 : vector<8x128xf32>, i32 -> vector<8x128xf32>
    %c97_i32_14 = arith.constant 97 : i32
    %56 = tpu.dynamic_rotate %54 by %c97_i32_14 dim 1 : vector<8x128xf32>, i32 -> vector<8x128xf32>
    %57 = arith.select %22, %55, %56 : vector<8x128xi1>, vector<8x128xf32>
    %58 = arith.addf %54, %57 : vector<8x128xf32>
    %c2_i32_15 = arith.constant 2 : i32
    %59 = tpu.dynamic_rotate %58 by %c2_i32_15 dim 1 : vector<8x128xf32>, i32 -> vector<8x128xf32>
    %c98_i32_16 = arith.constant 98 : i32
    %60 = tpu.dynamic_rotate %58 by %c98_i32_16 dim 1 : vector<8x128xf32>, i32 -> vector<8x128xf32>
    %61 = arith.select %24, %59, %60 : vector<8x128xi1>, vector<8x128xf32>
    %62 = arith.addf %58, %61 : vector<8x128xf32>
    %c4_i32_17 = arith.constant 4 : i32
    %63 = tpu.dynamic_rotate %62 by %c4_i32_17 dim 1 : vector<8x128xf32>, i32 -> vector<8x128xf32>
    %c100_i32_18 = arith.constant 100 : i32
    %64 = tpu.dynamic_rotate %62 by %c100_i32_18 dim 1 : vector<8x128xf32>, i32 -> vector<8x128xf32>
    %65 = arith.select %26, %63, %64 : vector<8x128xi1>, vector<8x128xf32>
    %66 = arith.addf %62, %65 : vector<8x128xf32>
    %c8_i32_19 = arith.constant 8 : i32
    %67 = tpu.dynamic_rotate %66 by %c8_i32_19 dim 1 : vector<8x128xf32>, i32 -> vector<8x128xf32>
    %c104_i32_20 = arith.constant 104 : i32
    %68 = tpu.dynamic_rotate %66 by %c104_i32_20 dim 1 : vector<8x128xf32>, i32 -> vector<8x128xf32>
    %69 = arith.select %28, %67, %68 : vector<8x128xi1>, vector<8x128xf32>
    %70 = arith.addf %66, %69 : vector<8x128xf32>
    %c16_i32_21 = arith.constant 16 : i32
    %71 = tpu.dynamic_rotate %70 by %c16_i32_21 dim 1 : vector<8x128xf32>, i32 -> vector<8x128xf32>
    %c112_i32_22 = arith.constant 112 : i32
    %72 = tpu.dynamic_rotate %70 by %c112_i32_22 dim 1 : vector<8x128xf32>, i32 -> vector<8x128xf32>
    %73 = arith.select %30, %71, %72 : vector<8x128xi1>, vector<8x128xf32>
    %74 = arith.addf %70, %73 : vector<8x128xf32>
    %cst_23 = arith.constant 3.125000e-02 : f32
    %75 = vector.broadcast %cst_23 : f32 to vector<8x128xf32>
    %76 = arith.mulf %74, %75 : vector<8x128xf32>
    %cst_24 = arith.constant 9.99999996E-13 : f32
    %77 = vector.broadcast %cst_24 : f32 to vector<8x128xf32>
    %78 = arith.addf %76, %77 : vector<8x128xf32>
    %79 = math.rsqrt %78 : vector<8x128xf32>
    %80 = arith.mulf %53, %79 : vector<8x128xf32>
    %c0_25 = arith.constant 0 : index
    %c0_26 = arith.constant 0 : index
    %81 = vector.load %arg4[%c0_25, %c0_26] : memref<2x128xf32, #tpu.memory_space<vmem>>, vector<1x128xf32>
    %c1 = arith.constant 1 : index
    %c0_27 = arith.constant 0 : index
    %82 = vector.load %arg4[%c1, %c0_27] : memref<2x128xf32, #tpu.memory_space<vmem>>, vector<1x128xf32>
    %83 = vector.broadcast %81 : vector<1x128xf32> to vector<8x128xf32>
    %84 = arith.mulf %80, %83 : vector<8x128xf32>
    %85 = vector.broadcast %82 : vector<1x128xf32> to vector<8x128xf32>
    %86 = arith.addf %84, %85 : vector<8x128xf32>
    %c0_28 = arith.constant 0 : index
    %c0_29 = arith.constant 0 : index
    %c0_30 = arith.constant 0 : index
    %87 = vector.load %arg5[%c0_28, %c0_29, %c0_30] : memref<1x8x128xf32, #tpu.memory_space<vmem>>, vector<1x8x128xf32>
    %88 = vector.shape_cast %87 : vector<1x8x128xf32> to vector<8x128xf32>
    %89 = vector.shape_cast %86 : vector<8x128xf32> to vector<1x8x128xf32>
    tpu.vector_store %arg5[%c0_28, %c0_29, %c0_30], %89 {strides = array<i32>} : memref<1x8x128xf32, #tpu.memory_space<vmem>>, vector<1x8x128xf32>,
    return
  }
  func.func @transform_0(%arg0: i32, %arg1: i32) -> (i32, i32, i32) {
    %c0_i32 = arith.constant 0 : i32
    %c0_i32_0 = arith.constant 0 : i32
    return %arg1, %arg0, %c0_i32 : i32, i32, i32
  }
  func.func @transform_1(%arg0: i32, %arg1: i32) -> (i32, i32) {
    %c0_i32 = arith.constant 0 : i32
    %c0_i32_0 = arith.constant 0 : i32
    return %arg0, %c0_i32 : i32, i32
  }
  func.func @transform_2(%arg0: i32, %arg1: i32) -> (i32, i32) {
    %c0_i32 = arith.constant 0 : i32
    %c0_i32_0 = arith.constant 0 : i32
    %c0_i32_1 = arith.constant 0 : i32
    return %c0_i32, %c0_i32_0 : i32, i32
  }
  func.func @transform_3(%arg0: i32, %arg1: i32) -> (i32, i32, i32) {
    %c0_i32 = arith.constant 0 : i32
    %c0_i32_0 = arith.constant 0 : i32
    return %arg1, %arg0, %c0_i32 : i32, i32, i32
  }
}

</mosaic_0001>

<bundles_post_ra>
// kernel: tpu_custom_call.1
= control target key start
LH: loop header
LB: loop body
LE: loop exit
PB: predicated region body
PF: predicated region fallthrough
CT: control target
= control target key end

     0   :  { %8 = vsyncpa [#allocation3], 0  ;;  %s981_s0 = inlined_call_operand.hbm [shape: f32[2,8,128], index: 0, kind: input, shape index: {}]   ;;  %s982_s1 = inlined_call_operand.hbm [shape: f32[8,128], index: 1, kind: input, shape index: {}]   ;;  %s983_s2 = inlined_call_operand.hbm [shape: f32[2,128], index: 2, kind: input, shape index: {}]   ;;  %s984_s3 = inlined_call_operand.hbm [shape: f32[2,8,128], index: 3, kind: output, shape index: {}]  }
   0x1   :  { %10 = vsyncpa [#allocation3 + $0x1], 0 }
   0x2   :  { %11 = vsyncpa [#allocation6], 0 }
   0x3   :  { %12 = vsyncpa [#allocation4], 0 }
   0x4   :  { %14 = vsyncpa [#allocation4 + $0x1], 0  ;;  %s788_s12 = smov 0   ;;  %s790_s13 = smov 0  }
   0x5   :  { %s792_s14 = smov 0   ;;  %s794_s15 = smov 0  }
   0x6   :  { %s796_s16 = smov 0   ;;  %s798_s17 = smov 0  }
   0x7 LB: > { %s464_s18 = sadd.s32 4294967295, %s754_s17   ;;  %s465_s19 = sadd.s32 4294967294, %s754_s17   ;;  %s754_s17 = sphi %s798_s17, %s20_s17   ;;  %s750_s16 = sphi %s796_s16, %s994_s16   ;;  %s746_s15 = sphi %s794_s15, %s993_s15   ;;  %s742_s14 = sphi %s792_s14, %s992_s14   ;;  %s738_s13 = sphi %s790_s13, %s991_s13   ;;  %s734_s12 = sphi %s788_s12, %s990_s12  }
   0x8   : > { %p54_p0 = scmp.ne.s32.totalorder %s738_s13, %s734_s12  ;;  %p822_p1 = scmp.eq.s32.totalorder %s464_s18, 0 }
   0x9   : > { %p133_p2 = scmp.eq.s32.totalorder %s465_s19, 1  ;;  %p466_p4 = scmp.ge.s32.totalorder %s754_s17, 1 }
   0xa   : > { %p828_p3 = por %p822_p1, %p54_p0  ;;  %p140_p6 = scmp.lt.s32.totalorder %s754_s17, 3 }
   0xb   : > { %p833_p5 = por %p133_p2, %p54_p0  ;;  %s154_s25 = sshll.u32 %s982_s1, 4  ;;  %s155_s25 = int_to_ptr.hbm [resolvable:$true] %s154_s25 }
   0xc   : > { %p841_p7 = pnand %p466_p4, %p140_p6  ;;  %p469_p8 = scmp.ge.s32.totalorder %s754_s17, 2 }
   0xd   : > { %s756_s27 = smov [#allocation5]   ;;  %s166_s4 = sshll.u32 %s983_s2, 4  ;;  %s167_s4 = int_to_ptr.hbm [resolvable:$true] %s166_s4 }
   0xe   : > { %p493_p9 = pneg %p841_p7  ;;  %s156_s28 = sshll.u32 %s756_s27, 4  ;;  %s157_s28 = int_to_ptr.vmem [resolvable:$true] %s156_s28 }
   0xf   : > { %s757_s5 = smov [#allocation7]   ;;  %p127_p11 = scmp.eq.s32.totalorder %s464_s18, 1 }
  0x10   : > { %p494_p10 = pnand %p493_p9, %p822_p1  ;;  %s168_s6 = sshll.u32 %s757_s5, 4  ;;  %s169_s6 = int_to_ptr.vmem [resolvable:$true] %s168_s6 }
  0x11   : > { %s29_s7 = sadd.s32 1, %s750_s16  ;;  %s41_s8 = sadd.s32 1, %s742_s14 }
  0x12   : > { %496 = dma.hbm_to_vmem [thread:$0]  (!%p494_p10), %s155_s25, 128, %s157_s28, [#allocation6]  }
  0x13   : > { %499 = dma.hbm_to_vmem [thread:$0]  (!%p494_p10), %s167_s4, 32, %s169_s6, [#allocation6]  }
  0x14   : > { %p30_p12 = scmp.ge.s32.totalorder %s29_s7, 2  ;;  %p48_p13 = scmp.ne.s32.totalorder %s742_s14, %s738_s13 }
  0x15   : > { %p49_p0 = scmp.eq.s32.totalorder %s754_s17, 0  ;;  %p510_p4 = scmp.lt.s32.totalorder %s754_s17, 2 }
  0x16   : > { %s996_s7 = smov (%p30_p12, %s29_s7), 0  ;;  %p860_p2 = por %p127_p11, %p48_p13 }
  0x17   : > { %s36_s10 = ssub.s32 %s750_s16, %s996_s7  ;;  %s179_s11 = sand.u32 1, %s742_s14  }
  0x18   : > { %p39_p6 = scmp.eq.s32.totalorder %s36_s10, 0  ;;  %p50_p9 = por %p49_p0, %p48_p13 }
  0x19   : > { %s470_s19 = sshll.u32 %s179_s11, 3  ;;  %s471_s18 = sshll.u32 %s750_s16, 3 }
  0x1a   : > { %s870_s23 = scalar_select %p39_p6, %s742_s14, %s41_s8  }
  0x1b   : > { %s188_s27 = scalar_lea.hbm %s981_s0, %s471_s18  ;;  %s183_s29 = scalar_lea.vmem [#allocation2], %s470_s19 }
  0x1c   : > { %s190_s28 = sshll.u32 %s188_s27, 4  ;;  %s192_s30 = sshll.u32 %s183_s29, 4  ;;  %s191_s28 = int_to_ptr.hbm [resolvable:$true] %s190_s28  ;;  %s193_s30 = int_to_ptr.vmem [resolvable:$true] %s192_s30 }
  0x1d   : > { %p501_p10 = pnand %p510_p4, %p50_p9  ;;  %s180_s4 = scalar_lea.sflag [#allocation3], %s179_s11 }
  0x1e   : > { %201 = sbr.rel (%p841_p7) target bundleno = 1258 (0x4ea), region = 32  ;;  %s880_s5 = sand.u32 (!%p841_p7), 1, %s738_s13  }
  0x1f   : > { %503 = dma.hbm_to_vmem [thread:$0]  (!%p501_p10), %s191_s28, 128, %s193_s30, %s180_s4  }
  0x20   : > { %s473_s6 = sshll.u32 (!%p841_p7), %s880_s5, 3  ;;  %s204_s8 = scalar_lea.sflag (!%p841_p7), [#allocation3], %s880_s5 }
  0x21   : > { %s207_s10 = scalar_lea.vmem (!%p841_p7), [#allocation2], %s473_s6 }
  0x23   : > { %721 = dma.done.wait (%p828_p3), %s204_s8, 128  }
  0x24   : > { %723 = vsyncadd (%p828_p3), %s204_s8, 4294967168 }
  0x25   : > { %725 = dma.done.wait (%p822_p1), [#allocation6], 160  }
  0x26   : > { %727 = vsyncadd (%p822_p1), [#allocation6], 4294967136  ;;  %v241_v0 = vld [vmem:[%s207_s10] sm:$0xff]  ;;  %v242_v1 = vld [vmem:[#allocation5] sm:$0xff]  ;;  %s758_s26 = smov 1   ;;  %s759_s11 = smov 97   ;;  %v244_v3 = vlaneseq }
  0x27   : > { %v243_v2 = vadd.f32 %v242_v1, %v241_v0  ;;  %s760_s20 = smov 2   ;;  %s761_s21 = smov 98   ;;  %v574_v57 = vld [vmem:[#allocation7] ss:$0 sm:$0xff]  ;;  %v575_v60 = vld [vmem:[#allocation7 + $0x1] ss:$0 sm:$0xff] }
  0x28   : > { %v245_v4 = vand.u32 127, %v244_v3  ;;  %s762_s19 = smov 4   ;;  %s763_s18 = smov 100  }
  0x29   : > { %263 = vrot.lane.b32.xlu0 %v243_v2, %s758_s26  ;;  %s764_s24 = smov 104   ;;  %s765_s25 = smov 8  }
  0x2a   : > { %v896_v6 = vand.u32 31, %v245_v4  ;;  %s766_s27 = smov 112   ;;  %s767_s28 = smov 16  }
  0x2b   : > { %s478_s29 = sshll.u32 %s746_s15, 3  ;;  %s240_s10 = scalar_lea.vmem [#allocation8], %s473_s6 }
  0x2c   : > { %vm258_vm0 = vcmp.ge.s32.totalorder %v896_v6, 1  ;;  %vm259_vm1 = vcmp.ge.s32.totalorder %v896_v6, 2  ;;  %vm260_vm2 = vcmp.ge.s32.totalorder %v896_v6, 4  ;;  %vm261_vm3 = vcmp.ge.s32.totalorder %v896_v6, 8  ;;  %s358_s8 = scalar_lea.hbm %s984_s3, %s478_s29  ;;  %s347_s15 = scalar_lea.sflag [#allocation4], %s880_s5 }
  0x2d   : > { %vm262_vm4 = vcmp.ge.s32.totalorder %v896_v6, 16 }
  0x31   : > { %265 = vrot.lane.b32.xlu0 %v243_v2, %s759_s11 }
  0x9b   : > { %v264_v5 = vpop.permute.xlu0 %263 }
  0xa3   : > { %v266_v7 = vpop.permute.xlu0 %265 }
  0xa4   : > { %v267_v8 = vsel %vm258_vm0, %v264_v5, %v266_v7 }
  0xa5   : > { %v268_v9 = vadd.f32 %v267_v8, %v243_v2 }
  0xa7   : > { %269 = vrot.lane.b32.xlu1 %v268_v9, %s760_s20 }
  0xaf   : > { %271 = vrot.lane.b32.xlu1 %v268_v9, %s761_s21 }
 0x119   : > { %v270_v10 = vpop.permute.xlu1 %269 }
 0x121   : > { %v272_v11 = vpop.permute.xlu1 %271 }
 0x122   : > { %v273_v12 = vsel %vm259_vm1, %v270_v10, %v272_v11 }
 0x123   : > { %v274_v13 = vadd.f32 %v273_v12, %v268_v9 }
 0x125   : > { %275 = vrot.lane.b32.xlu2 %v274_v13, %s762_s19 }
 0x12d   : > { %277 = vrot.lane.b32.xlu2 %v274_v13, %s763_s18 }
 0x17f   : > { %v276_v14 = vpop.permute.xlu2 %275 }
 0x187   : > { %v278_v15 = vpop.permute.xlu2 %277 }
 0x188   : > { %v279_v16 = vsel %vm260_vm2, %v276_v14, %v278_v15 }
 0x189   : > { %v280_v17 = vadd.f32 %v279_v16, %v274_v13 }
 0x18b   : > { %283 = vrot.lane.b32.xlu1 %v280_v17, %s764_s24  ;;  %281 = vrot.lane.b32.xlu0 %v280_v17, %s765_s25 }
 0x1fd   : > { %v284_v18 = vpop.permute.xlu1 %283  ;;  %v282_v19 = vpop.permute.xlu0 %281 }
 0x1fe   : > { %v285_v20 = vsel %vm261_vm3, %v282_v19, %v284_v18 }
 0x1ff   : > { %v286_v21 = vadd.f32 %v285_v20, %v280_v17 }
 0x201   : > { %289 = vrot.lane.b32.xlu0 %v286_v21, %s766_s27  ;;  %287 = vrot.lane.b32.xlu2 %v286_v21, %s767_s28 }
 0x25b   : > { %v288_v22 = vpop.permute.xlu2 %287 }
 0x273   : > { %v290_v23 = vpop.permute.xlu0 %289 }
 0x274   : > { %v291_v24 = vsel %vm262_vm4, %v288_v22, %v290_v23 }
 0x275   : > { %v292_v25 = vadd.f32 %v291_v24, %v286_v21 }
 0x277   : > { %v293_v26 = vmul.f32 0.03125, %v292_v25 }
 0x279   : > { %v294_v27 = vsub.f32 %v243_v2, %v293_v26 }
 0x27b   : > { %v295_v28 = vmul.f32 %v294_v27, %v294_v27 }
 0x27d   : > { %298 = vrot.lane.b32.xlu2 %v295_v28, %s759_s11  ;;  %296 = vrot.lane.b32.xlu1 %v295_v28, %s758_s26  ;;  %s360_s26 = sshll.u32 %s240_s10, 4  ;;  %s362_s11 = sshll.u32 %s358_s8, 4  ;;  %s361_s26 = int_to_ptr.vmem [resolvable:$true] %s360_s26  ;;  %s363_s11 = int_to_ptr.hbm [resolvable:$true] %s362_s11 }
 0x2d7   : > { %v299_v29 = vpop.permute.xlu2 %298 }
 0x2ef   : > { %v297_v30 = vpop.permute.xlu1 %296 }
 0x2f0   : > { %v300_v31 = vsel %vm258_vm0, %v297_v30, %v299_v29 }
 0x2f1   : > { %v301_v32 = vadd.f32 %v300_v31, %v295_v28 }
 0x2f3   : > { %304 = vrot.lane.b32.xlu1 %v301_v32, %s761_s21  ;;  %302 = vrot.lane.b32.xlu0 %v301_v32, %s760_s20  ;;  %s682_s20 = sshra.s32 %s363_s11, 4  ;;  %s683_s20 = int_to_ptr.hbm [resolvable:$true] %s682_s20 }
 0x2f4   : > { %s684_s21 = scalar_lea.hbm %s683_s20, 8  ;;  %p689_p11 = scmp.lt.s32.totalorder %s683_s20, %s984_s3 }
 0x2f5   : > { %p685_p1 = scmp.ne.s32.totalorder %s683_s20, %s684_s21 }
 0x2f7   : > { %p686_p3 = pnand %p685_p1, %p860_p2 }
 0x2f9   : > { %p687_p7 = pneg %p686_p3 }
 0x365   : > { %v305_v33 = vpop.permute.xlu1 %304  ;;  %v303_v34 = vpop.permute.xlu0 %302 }
 0x366   : > { %v306_v35 = vsel %vm259_vm1, %v303_v34, %v305_v33 }
 0x367   : > { %v307_v36 = vadd.f32 %v306_v35, %v301_v32 }
 0x369   : > { %310 = vrot.lane.b32.xlu0 %v307_v36, %s763_s18  ;;  %308 = vrot.lane.b32.xlu2 %v307_v36, %s762_s19 }
 0x3c3   : > { %v309_v37 = vpop.permute.xlu2 %308 }
 0x3db   : > { %v311_v38 = vpop.permute.xlu0 %310 }
 0x3dc   : > { %v312_v39 = vsel %vm260_vm2, %v309_v37, %v311_v38 }
 0x3dd   : > { %v313_v40 = vadd.f32 %v312_v39, %v307_v36 }
 0x3df   : > { %316 = vrot.lane.b32.xlu2 %v313_v40, %s764_s24  ;;  %314 = vrot.lane.b32.xlu1 %v313_v40, %s765_s25  ;;  %s688_s24 = scalar_lea.hbm %s984_s3, 16 }
 0x3e0   : > { %p690_p12 = scmp.lt.s32.totalorder %s688_s24, %s684_s21 }
 0x3e2   : > { %p691_p13 = por %p690_p12, %p689_p11 }
 0x3e4   : > { %p692_p0 = pnand %p691_p13, %p687_p7 }
 0x439   : > { %v317_v41 = vpop.permute.xlu2 %316 }
 0x451   : > { %v315_v42 = vpop.permute.xlu1 %314 }
 0x452   : > { %v318_v43 = vsel %vm261_vm3, %v315_v42, %v317_v41 }
 0x453   : > { %v319_v44 = vadd.f32 %v318_v43, %v313_v40 }
 0x455   : > { %322 = vrot.lane.b32.xlu1 %v319_v44, %s766_s27  ;;  %320 = vrot.lane.b32.xlu0 %v319_v44, %s767_s28 }
 0x4c7   : > { %v323_v45 = vpop.permute.xlu1 %322  ;;  %v321_v46 = vpop.permute.xlu0 %320 }
 0x4c8   : > { %v324_v47 = vsel %vm262_vm4, %v321_v46, %v323_v45 }
 0x4c9   : > { %v325_v48 = vadd.f32 %v324_v47, %v319_v44 }
 0x4cb   : > { %v326_v49 = vmul.f32 0.03125, %v325_v48 }
 0x4cd   : > { %v327_v50 = vadd.f32 1e-12, %v326_v49 }
 0x4cf   : > { %576 = vrsqrt.f32 %v327_v50  ;;  %vm334_vm6 = vweird.f32 %v327_v50 }
 0x4d5   : > { %v577_v51 = vpop.eup %576 }
 0x4d6   : > { %v329_v52 = vmul.f32 %v577_v51, %v327_v50  ;;  %vm335_vm5 = vweird.f32 %v577_v51 }
 0x4d7   : > { %vm336_vm7 = vmor %vm334_vm6, %vm335_vm5 }
 0x4d8   : > { %v330_v53 = vmul.f32 %v577_v51, %v329_v52 }
 0x4da   : > { %v331_v54 = vmul.f32 0.5, %v330_v53 }
 0x4dc   : > { %v332_v55 = vsub.f32 1.5, %v331_v54 }
 0x4de   : > { %v333_v56 = vmul.f32 %v577_v51, %v332_v55 }
 0x4e0   : > { %v337_v58 = vsel %vm336_vm7, %v577_v51, %v333_v56 }
 0x4e1   : > { %v338_v59 = vmul.f32 %v337_v58, %v294_v27 }
 0x4e3   : > { %v342_v61 = vmul.f32 %v574_v57, %v338_v59 }
 0x4e5   : > { %v344_v62 = vadd.f32 %v575_v60, %v342_v61 }
 0x4e7   : > { %345 = vst [vmem:[%s240_s10] sm:$0xff] %v344_v62 }
 0x4e8   : > { %695 = shalt.err (!%p692_p0)
}
 0x4e9   : > { %491 = dma.vmem_to_hbm [thread:$0]  (%p860_p2), %s361_s26, 128, %s363_s11, %s347_s15  }
 0x4ea PF: > { %s374_s5 = sand.u32 1, %s734_s12   ;;  %p505_p4 = pnand %p469_p8, %p833_p5 }
 0x4eb   : > { %s375_s27 = scalar_lea.sflag [#allocation4], %s374_s5 }
 0x4ec   : > { %p506_p6 = pneg %p505_p4 }
 0x4ee   : > { %729 = dma.done.wait (%p506_p6), %s375_s27, 128  }
 0x4ef   : > { %731 = vsyncadd (%p506_p6), %s375_s27, 4294967168  ;;  %s20_s17 = sadd.s32 1, %s754_s17   ;;  %s990_s12 = smov %s738_s13 }
 0x4f0   : > { %p17_p9 = scmp.ge.s32.totalorder %s20_s17, 4   ;;  %s991_s13 = smov %s742_s14 }
 0x4f1   : > { %s992_s14 = smov %s870_s23  ;;  %s993_s15 = smov %s750_s16 }
 0x4f2   : > { %s994_s16 = smov %s996_s7  ;;  %19 = sbr.rel (!%p17_p9) target bundleno = 7 (0x7), region = 86 }
 0x4f7   :  { %381 = vsyncpa [#allocation3], 1 }
 0x4f8   :  { %383 = vsyncpa [#allocation3 + $0x1], 1 }
 0x4f9   :  { %384 = vsyncpa [#allocation6], 1 }
 0x4fa   :  { %385 = vsyncpa [#allocation4], 1 }
 0x4fb   :  { %387 = vsyncpa [#allocation4 + $0x1], 1 }

</bundles_post_ra>
